<compile_context>
chip_gen: v7x
topology: tpu7x:2x2x1
jax: 0.10.0
libtpu: 0.0.40
codegen_flags: <defaults>
</compile_context>

<pallas_src>
import math

import jax
import jax.numpy as jnp
from jax.experimental import pallas as pl
from jax.experimental.pallas import tpu as pltpu


# ---------------------------------------------------------------------------
# Fused kernel: Linear1 -> ReLU -> Linear2, transposes folded away
# ---------------------------------------------------------------------------
def _elem_ff_kernel(x_ref, w1_ref, b1_ref, w2_ref, b2_ref, o_ref):
    x = x_ref[0]          # (d_in, L)
    w1 = w1_ref[...]      # (d_forward, d_in)   -- PyTorch Linear1.weight layout
    b1 = b1_ref[...]      # (d_forward, 1)
    w2 = w2_ref[...]      # (d_in, d_forward)   -- PyTorch Linear2.weight layout
    b2 = b2_ref[...]      # (d_in, 1)

    # Linear1 along the feature axis without materializing the transpose.
    h = jnp.dot(w1, x, preferred_element_type=jnp.float32) + b1   # (d_forward, L)
    h = jnp.maximum(h, jnp.float32(0.0))                          # ReLU
    o = jnp.dot(w2, h, preferred_element_type=jnp.float32) + b2   # (d_in, L)
    o_ref[0] = o.astype(o_ref.dtype)


# ---------------------------------------------------------------------------
# Wrapper
# ---------------------------------------------------------------------------
def elem_feed_forward(x, params):
    """x: (B, d_in, L) float32. Returns (B, d_in, L). Dropout = identity (eval)."""
    B, d_in, L = x.shape
    w1 = params["w1"]                 # (d_forward, d_in)
    b1 = params["b1"]                 # (d_forward,)
    w2 = params["w2"]                 # (d_in, d_forward)
    b2 = params["b2"]                 # (d_in,)
    d_forward = w1.shape[0]

    b1c = b1.reshape(d_forward, 1)
    b2c = b2.reshape(d_in, 1)

    return pl.pallas_call(
        _elem_ff_kernel,
        out_shape=jax.ShapeDtypeStruct((B, d_in, L), x.dtype),
        grid_spec=pltpu.PrefetchScalarGridSpec(
            num_scalar_prefetch=0,
            grid=(B,),
            in_specs=[
                pl.BlockSpec((1, d_in, L), lambda b: (b, 0, 0)),
                pl.BlockSpec((d_forward, d_in), lambda b: (0, 0)),
                pl.BlockSpec((d_forward, 1), lambda b: (0, 0)),
                pl.BlockSpec((d_in, d_forward), lambda b: (0, 0)),
                pl.BlockSpec((d_in, 1), lambda b: (0, 0)),
            ],
            out_specs=pl.BlockSpec((1, d_in, L), lambda b: (b, 0, 0)),
        ),
        compiler_params=pltpu.CompilerParams(
            dimension_semantics=("parallel",)),
    )(x, w1, b1c, w2, b2c)


# ---------------------------------------------------------------------------
# Pure-JAX reference mirroring the PyTorch forward (eval mode)
# ---------------------------------------------------------------------------
def reference_ff(x, params):
    r = jnp.transpose(x, (0, 2, 1))                      # (B, L, d_in)
    r = r @ params["w1"].T + params["b1"]                # (B, L, d_forward)
    r = jnp.maximum(r, 0.0)
    r = r @ params["w2"].T + params["b2"]                # (B, L, d_in)
    return jnp.transpose(r, (0, 2, 1))                   # (B, d_in, L)


# ---------------------------------------------------------------------------
# Deterministic parameter init (PyTorch-Linear-like uniform bounds)
# ---------------------------------------------------------------------------
def init_params(key, d_in, d_forward):
    k0, k1, k2, k3 = jax.random.split(key, 4)
    bound1 = 1.0 / math.sqrt(d_in)
    bound2 = 1.0 / math.sqrt(d_forward)
    w1 = jax.random.uniform(k0, (d_forward, d_in), jnp.float32, -bound1, bound1)
    b1 = jax.random.uniform(k1, (d_forward,), jnp.float32, -bound1, bound1)
    w2 = jax.random.uniform(k2, (d_in, d_forward), jnp.float32, -bound2, bound2)
    b2 = jax.random.uniform(k3, (d_in,), jnp.float32, -bound2, bound2)
    return {"w1": w1, "b1": b1, "w2": w2, "b2": b2}


if __name__ == "__main__":
    B, d_in, L, d_forward = 2, 18, 16, 32   # d_input=18 fixed by the module

    key = jax.random.PRNGKey(0)
    kx, kp = jax.random.split(key, 2)

    x = jax.random.normal(kx, (B, d_in, L), jnp.float32)
    params = init_params(kp, d_in, d_forward)

    out = elem_feed_forward(x, params)
    out = jax.block_until_ready(out)

    ref = reference_ff(x, params)
    assert out.shape == (B, d_in, L)
    assert jnp.allclose(out, ref, atol=1e-5, rtol=1e-5), "mismatch vs reference"

    print("KERNEL_OK")
</pallas_src>

<mosaic_0001>
module attributes {stable_mosaic.version = 11 : i64} {
  func.func @_elem_ff_kernel(%arg0: i32, %arg1: memref<1x18x16xf32, #tpu.memory_space<vmem>>, %arg2: memref<32x18xf32, #tpu.memory_space<vmem>>, %arg3: memref<32x1xf32, #tpu.memory_space<vmem>>, %arg4: memref<18x32xf32, #tpu.memory_space<vmem>>, %arg5: memref<18x1xf32, #tpu.memory_space<vmem>>, %arg6: memref<1x18x16xf32, #tpu.memory_space<vmem>>) attributes {dimension_semantics = [#tpu.dimension_semantics<parallel>], iteration_bounds = array<i64: 2>, scalar_prefetch = 0 : i64, scratch_operands = 0 : i64, tpu.core_type = #tpu.core_type<tc>, window_params = [{transform_indices = @transform_0, window_bounds = array<i64: 1, 18, 16>}, {pipeline_mode = #tpu.pipeline_mode<synchronous>, transform_indices = @transform_1, window_bounds = array<i64: 32, 18>}, {pipeline_mode = #tpu.pipeline_mode<synchronous>, transform_indices = @transform_2, window_bounds = array<i64: 32, 1>}, {pipeline_mode = #tpu.pipeline_mode<synchronous>, transform_indices = @transform_3, window_bounds = array<i64: 18, 32>}, {pipeline_mode = #tpu.pipeline_mode<synchronous>, transform_indices = @transform_4, window_bounds = array<i64: 18, 1>}, {transform_indices = @transform_5, window_bounds = array<i64: 1, 18, 16>}]} {
    %c0 = arith.constant 0 : index
    %c0_0 = arith.constant 0 : index
    %c0_1 = arith.constant 0 : index
    %0 = vector.load %arg1[%c0, %c0_0, %c0_1] : memref<1x18x16xf32, #tpu.memory_space<vmem>>, vector<1x18x16xf32>
    %1 = vector.shape_cast %0 : vector<1x18x16xf32> to vector<18x16xf32>
    %c0_2 = arith.constant 0 : index
    %c0_3 = arith.constant 0 : index
    %2 = vector.load %arg2[%c0_2, %c0_3] : memref<32x18xf32, #tpu.memory_space<vmem>>, vector<32x18xf32>
    %c0_4 = arith.constant 0 : index
    %c0_5 = arith.constant 0 : index
    %3 = vector.load %arg3[%c0_4, %c0_5] : memref<32x1xf32, #tpu.memory_space<vmem>>, vector<32x1xf32>
    %c0_6 = arith.constant 0 : index
    %c0_7 = arith.constant 0 : index
    %4 = vector.load %arg4[%c0_6, %c0_7] : memref<18x32xf32, #tpu.memory_space<vmem>>, vector<18x32xf32>
    %c0_8 = arith.constant 0 : index
    %c0_9 = arith.constant 0 : index
    %5 = vector.load %arg5[%c0_8, %c0_9] : memref<18x1xf32, #tpu.memory_space<vmem>>, vector<18x1xf32>
    %cst = arith.constant dense<0.000000e+00> : vector<32x16xf32>
    %6 = tpu.matmul %2, %1, %cst {dimension_numbers = #tpu.dot_dimension_numbers<[1], [0], [0], [1], [0, 0, 1, 1], [], []>} : vector<32x18xf32>, vector<18x16xf32>, vector<32x16xf32> -> vector<32x16xf32>
    %7 = vector.broadcast %3 : vector<32x1xf32> to vector<32x16xf32>
    %8 = arith.addf %6, %7 : vector<32x16xf32>
    %cst_10 = arith.constant 0.000000e+00 : f32
    %9 = vector.broadcast %cst_10 : f32 to vector<32x16xf32>
    %10 = arith.maximumf %8, %9 : vector<32x16xf32>
    %cst_11 = arith.constant dense<0.000000e+00> : vector<18x16xf32>
    %11 = tpu.matmul %4, %10, %cst_11 {dimension_numbers = #tpu.dot_dimension_numbers<[1], [0], [0], [1], [0, 0, 1, 1], [], []>} : vector<18x32xf32>, vector<32x16xf32>, vector<18x16xf32> -> vector<18x16xf32>
    %12 = vector.broadcast %5 : vector<18x1xf32> to vector<18x16xf32>
    %13 = arith.addf %11, %12 : vector<18x16xf32>
    %c0_12 = arith.constant 0 : index
    %c0_13 = arith.constant 0 : index
    %c0_14 = arith.constant 0 : index
    %14 = vector.load %arg6[%c0_12, %c0_13, %c0_14] : memref<1x18x16xf32, #tpu.memory_space<vmem>>, vector<1x18x16xf32>
    %15 = vector.shape_cast %14 : vector<1x18x16xf32> to vector<18x16xf32>
    %16 = vector.shape_cast %13 : vector<18x16xf32> to vector<1x18x16xf32>
    tpu.vector_store %arg6[%c0_12, %c0_13, %c0_14], %16 {strides = array<i32>} : memref<1x18x16xf32, #tpu.memory_space<vmem>>, vector<1x18x16xf32>,
    return
  }
  func.func @transform_0(%arg0: i32) -> (i32, i32, i32) {
    %c0_i32 = arith.constant 0 : i32
    %c0_i32_0 = arith.constant 0 : i32
    %c0_i32_1 = arith.constant 0 : i32
    return %arg0, %c0_i32, %c0_i32_0 : i32, i32, i32
  }
  func.func @transform_1(%arg0: i32) -> (i32, i32) {
    %c0_i32 = arith.constant 0 : i32
    %c0_i32_0 = arith.constant 0 : i32
    %c0_i32_1 = arith.constant 0 : i32
    return %c0_i32, %c0_i32_0 : i32, i32
  }
  func.func @transform_2(%arg0: i32) -> (i32, i32) {
    %c0_i32 = arith.constant 0 : i32
    %c0_i32_0 = arith.constant 0 : i32
    %c0_i32_1 = arith.constant 0 : i32
    return %c0_i32, %c0_i32_0 : i32, i32
  }
  func.func @transform_3(%arg0: i32) -> (i32, i32) {
    %c0_i32 = arith.constant 0 : i32
    %c0_i32_0 = arith.constant 0 : i32
    %c0_i32_1 = arith.constant 0 : i32
    return %c0_i32, %c0_i32_0 : i32, i32
  }
  func.func @transform_4(%arg0: i32) -> (i32, i32) {
    %c0_i32 = arith.constant 0 : i32
    %c0_i32_0 = arith.constant 0 : i32
    %c0_i32_1 = arith.constant 0 : i32
    return %c0_i32, %c0_i32_0 : i32, i32
  }
  func.func @transform_5(%arg0: i32) -> (i32, i32, i32) {
    %c0_i32 = arith.constant 0 : i32
    %c0_i32_0 = arith.constant 0 : i32
    %c0_i32_1 = arith.constant 0 : i32
    return %arg0, %c0_i32, %c0_i32_0 : i32, i32, i32
  }
}

</mosaic_0001>

<bundles_post_ra>
// kernel: tpu_custom_call.1
= control target key start
LH: loop header
LB: loop body
LE: loop exit
PB: predicated region body
PF: predicated region fallthrough
CT: control target
= control target key end

     0   :  { %s660_s18 = smov 0   ;;  %s733_s0 = inlined_call_operand.vmem [shape: f32[2,18,16], index: 0, kind: input, shape index: {}]   ;;  %s734_s1 = inlined_call_operand.vmem [shape: f32[32,18], index: 1, kind: input, shape index: {}]   ;;  %s735_s2 = inlined_call_operand.vmem [shape: f32[32,1], index: 2, kind: input, shape index: {}]   ;;  %s736_s3 = inlined_call_operand.vmem [shape: f32[18,32], index: 3, kind: input, shape index: {}]   ;;  %s737_s4 = inlined_call_operand.vmem [shape: f32[18,1], index: 4, kind: input, shape index: {}]   ;;  %s738_s5 = inlined_call_operand.vmem [shape: f32[2,18,16], index: 5, kind: output, shape index: {}]  }
   0x1 LB: > { %s533_s19 = sadd.s32 4294967295, %s624_s18   ;;  %p537_p0 = scmp.ge.s32.totalorder %s624_s18, 1  ;;  %s624_s18 = sphi %s660_s18, %s15_s18  }
   0x2   : > { %p187_p1 = scmp.lt.s32.totalorder %s624_s18, 3 }
   0x4   : > { %p188_p2 = pnand %p537_p0, %p187_p1 }
   0x5   : > { %p215_p3 = scmp.lt.s32.totalorder (!%p188_p2), %s533_s19, 1  ;;  %v228_v0 = vld [vmem:[%s734_s1] sm:$0xff] (!%p188_p2)  ;;  %vm262_vm0 = vcmask (!%p188_p2), 146432   ;;  %v626_v2 = vmov (!%p188_p2), 0   ;;  %v234_v3 = vld [vmem:[%s735_s2 + $0x10] sm:$0xff] (!%p188_p2)  ;;  %v233_v4 = vld [vmem:[%s735_s2 + $0x8] sm:$0xff] (!%p188_p2) }
   0x6   : > { %191 = sbr.rel (%p188_p2) target bundleno = 475 (0x1db), region = 40  ;;  %570 = vmatprep.mubr.msk.f32.mxu0 (!%p188_p2), %vm262_vm0, %v228_v0  ;;  %v232_v1 = vld [vmem:[%s735_s2] sm:$0xff] (!%p188_p2)  ;;  %616 = vset.pattern.permute.xlu0 (!%p188_p2), %v626_v2  ;;  %v235_v5 = vld [vmem:[%s735_s2 + $0x18] sm:$0xff] (!%p188_p2)  ;;  %vm275_vm1 = vcmask (!%p188_p2), 1041408   ;;  %v240_v11 = vld [vmem:[%s737_s4 + $0x8] sm:$0xff] (!%p188_p2)  ;;  %v627_v16 = vmov (!%p188_p2), 0.0|0.0  }
   0x7   : > { %617 = vset.pattern.permute.xlu1 (!%p188_p2), %v626_v2  ;;  %244 = vperm.xlu0 (!%p188_p2), %616, %v232_v1   ;;  %v239_v9 = vld [vmem:[%s737_s4] sm:$0xff] (!%p188_p2)  ;;  %v241_v12 = vld [vmem:[%s737_s4 + $0x10] sm:$0x3] (!%p188_p2)  ;;  %v229_v13 = vld [vmem:[%s734_s1 + $0x8] sm:$0xff] (!%p188_p2)  ;;  %vm628_vm2 = vmmov (!%p188_p2), 0   ;;  %v629_v17 = vmov (!%p188_p2), 0.0  }
   0x8   : > { %254 = vperm.xlu1 (!%p188_p2), %617, %v234_v3   ;;  %v230_v14 = vld [vmem:[%s734_s1 + $0x10] sm:$0xff] (!%p188_p2)  ;;  %v231_v15 = vld [vmem:[%s734_s1 + $0x18] sm:$0xff] (!%p188_p2)  ;;  %597 = vmatprep.subr.bf16.mxu1 (!%p188_p2), %v627_v16  ;;  %v236_v36 = vld [vmem:[%s736_s3] sm:$0xff] (!%p188_p2)  ;;  %vm383_vm3 = vcmask (!%p188_p2), 261120   ;;  %vm473_vm4 = vcmask (!%p188_p2), 130048   ;;  %vm476_vm5 = vcmask (!%p188_p2), 123904  }
   0x9   : > { %584 = vmatprep.mubr.msk.f32.mxu1 (!%p188_p2), %vm628_vm2, %v629_v17  ;;  %v237_v37 = vld [vmem:[%s736_s3 + $0x8] sm:$0xff] (!%p188_p2)  ;;  %v238_v38 = vld [vmem:[%s736_s3 + $0x10] sm:$0x3] (!%p188_p2) }
   0xb   : > { %249 = vperm.xlu0 (!%p188_p2), %616, %v233_v4  }
   0xc   : > { %259 = vperm.xlu1 (!%p188_p2), %617, %v235_v5  }
   0xd   : > { %s740_s19 = smov (!%p215_p3, %s533_s19), 1 }
   0xe   : > { %s603_s26 = smul.u32 24, %s740_s19 }
   0xf   : > { %370 = vperm.xlu0 %616, %v239_v9  }
  0x10   : > { %s219_s8 = scalar_lea.vmem %s733_s0, %s603_s26  ;;  %375 = vperm.xlu1 %617, %v240_v11   ;;  %s224_s7 = scalar_lea.vmem %s738_s5, %s603_s26 }
  0x11   : > { %v225_v6 = vld [vmem:[%s219_s8] sm:$0xff]  ;;  %v226_v7 = vld [vmem:[%s219_s8 + $0x8] sm:$0xff]  ;;  %v227_v10 = vld [vmem:[%s219_s8 + $0x10] sm:$0x3] }
  0x12   : > { %v593_v8 = vpack.c.bf16 %v226_v7, %v225_v6 }
  0x13   : > { %380 = vperm.xlu0 %616, %v241_v12  }
  0x14   : > { %594 = vmatprep.subr.bf16.mxu0 %v593_v8 }
  0x15   : > { %596 = vmatpush3.bf16.msra.mxu0 %v593_v8 }
  0x16   : > { %568 = vmatprep.subr.msk.mxu0 %vm275_vm1, %v227_v10 }
  0x19   : > { %569 = vmatpush3.msk.msra.mxu0 %vm275_vm1, %v227_v10 }
  0x1a   : > { %571 = vmatmul.mubr.msk.f32.vlgmr.msra.gmra.mrb[0].mxu0 %vm262_vm0, %v229_v13 }
  0x1b   : > { %573 = vmatprep.mubr.msk.f32.mxu0 %vm262_vm0, %v230_v14 }
  0x1e   : > { %574 = vmatmul.mubr.msk.f32.gmra.mrb[2].mxu0 %vm262_vm0, %v231_v15 }
  0x86   : > { %v245_v18 = vpop.permute.xlu0 %244 }
  0x87   : > { %v255_v19 = vpop.permute.xlu1 %254 }
  0x8a   : > { %v250_v20 = vpop.permute.xlu0 %249 }
  0x8b   : > { %v260_v26 = vpop.permute.xlu1 %259 }
  0x8e   : > { %v371_v39 = vpop.permute.xlu0 %370 }
  0x8f   : > { %v376_v43 = vpop.permute.xlu1 %375 }
  0x92   : > { %v381_v47 = vpop.permute.xlu0 %380 }
  0xed   : > { %v572_v21 = vpop.f32.mrb[0].mxu0 }
  0xee   : > { %v351_v22 = vadd.f32 %v572_v21, %v250_v20  ;;  %v345_v23 = vpop.f32.mrb[1].mxu0 }
  0xef   : > { %v346_v24 = vadd.f32 %v345_v23, %v245_v18 }
  0xf0   : > { %v365_v25 = vmax.f32 %v351_v22, 0.0 }
  0xf1   : > { %v364_v27 = vmax.f32 %v346_v24, 0.0  ;;  %v575_v28 = vpop.f32.mrb[2].mxu0 }
  0xf2   : > { %v361_v29 = vadd.f32 %v575_v28, %v260_v26  ;;  %v355_v30 = vpop.f32.mrb[3].mxu0 }
  0xf3   : > { %v356_v31 = vadd.f32 %v355_v30, %v255_v19  ;;  %v598_v32 = vpack.c.bf16 %v365_v25, %v364_v27 }
  0xf4   : > { %v367_v33 = vmax.f32 %v361_v29, 0.0 }
  0xf5   : > { %v366_v34 = vmax.f32 %v356_v31, 0.0  ;;  %599 = vmatpush3.bf16.msra.mxu1 %v598_v32 }
  0xf6   : > { %600 = vmatprep.subr.bf16.mxu1 %v627_v16 }
  0xf7   : > { %v601_v35 = vpack.c.bf16 %v367_v33, %v366_v34 }
  0xf9   : > { %602 = vmatpush3.bf16.msra.mxu1 %v601_v35 }
  0xfc   : > { %585 = vmatmul.mubr.msk.f32.vlgmr.msra.gmra.mrb[0].mxu1 %vm383_vm3, %v236_v36 }
  0xfd   : > { %587 = vmatprep.mubr.msk.f32.mxu1 %vm628_vm2, %v629_v17 }
 0x100   : > { %588 = vmatmul.mubr.msk.f32.gmra.mrb[2].mxu1 %vm383_vm3, %v237_v37 }
 0x101   : > { %590 = vmatprep.mubr.msk.f32.mxu1 %vm628_vm2, %v629_v17 }
 0x104   : > { %591 = vmatmul.mubr.msk.f32.gmra.mrb[4].mxu1 %vm383_vm3, %v238_v38 }
 0x1cf   : > { %v459_v40 = vpop.f32.mrb[0].mxu1 }
 0x1d0   : > { %v460_v41 = vadd.f32 %v459_v40, %v371_v39  ;;  %v586_v42 = vpop.f32.mrb[1].mxu1 }
 0x1d2   : > { %474 = vst.msk [vmem:[%s224_s7] sm:$0xff] %vm473_vm4, %v460_v41 }
 0x1d3   : > { %v464_v44 = vpop.f32.mrb[2].mxu1 }
 0x1d4   : > { %v465_v45 = vadd.f32 %v464_v44, %v376_v43  ;;  %v589_v46 = vpop.f32.mrb[3].mxu1 }
 0x1d6   : > { %475 = vst.msk [vmem:[%s224_s7 + $0x8] sm:$0xff] %vm473_vm4, %v465_v45 }
 0x1d7   : > { %v469_v48 = vpop.f32.mrb[4].mxu1 }
 0x1d8   : > { %v470_v49 = vadd.f32 %v469_v48, %v381_v47  ;;  %v592_v50 = vpop.f32.mrb[5].mxu1 }
 0x1da   : > { %477 = vst.msk [vmem:[%s224_s7 + $0x10] sm:$0x3] %vm476_vm5, %v470_v49 }
 0x1db PF: > { %s15_s18 = sadd.s32 1, %s624_s18  }
 0x1dc   : > { %p12_p4 = scmp.ge.s32.totalorder %s15_s18, 4  }
 0x1de   :  { %14 = sbr.rel (!%p12_p4) target bundleno = 1 (0x1), region = 70 }

</bundles_post_ra>
